<compile_context>
chip_gen: v7x
topology: tpu7x:2x2x1
jax: 0.10.0
libtpu: 0.0.40
codegen_flags: <defaults>
</compile_context>

<pallas_src>
import jax
import jax.numpy as jnp
from jax.experimental import pallas as pl
from jax.experimental.pallas import tpu as pltpu


def _round_up(x, m):
    return ((x + m - 1) // m) * m


def _pad2(a, rows, cols):
    pr, pc = rows - a.shape[0], cols - a.shape[1]
    if pr or pc:  # skip the pad entirely when already aligned
        a = jnp.pad(a, ((0, pr), (0, pc)))
    return a


def _probe_buffered_one():
    """Return pl.Buffered(1) if this jax build accepts it on a BlockSpec, else None."""
    try:
        mode = pl.Buffered(1)
        pl.BlockSpec((8, 128), lambda i: (0, 0), pipeline_mode=mode)
        return mode
    except (AttributeError, TypeError):
        return None


_BUFFERED_ONE = _probe_buffered_one()


def _const_spec(shape, weight_mode):
    """BlockSpec for a grid-invariant (resident) operand."""
    idx = lambda *_: (0,) * len(shape)
    if weight_mode is not None:
        return pl.BlockSpec(shape, idx, pipeline_mode=weight_mode)
    return pl.BlockSpec(shape, idx)


def _tpu_budget_and_cores():
    """(usable VMEM budget in bytes, #TensorCores to shard the batch grid across)."""
    phys = 64 << 20                       # conservative default: v7x per-TC VMEM
    try:
        phys = int(pltpu.get_tpu_info().vmem_capacity_bytes)
    except Exception:                     # hardware query only; never masks kernel errors
        pass
    budget = (phys * 3) // 4              # ~96 MiB on 128-MiB chips, ~48 MiB on v7x
    kind = ""
    try:
        kind = jax.devices()[0].device_kind.lower()
    except Exception:
        pass
    multi_tc = any(t in kind for t in ("v7", "7x", "v4", "v5p"))
    return budget, (2 if multi_tc else 1)


# --------------------------------------------------------------------------------------
# Kernels
# --------------------------------------------------------------------------------------

def mlp_resident_kernel(x_ref, w1_ref, b1_ref, w2_ref, b2_ref, o_ref, h_ref):
    # fc1: MXU matmul with f32 accumulation; bias + ReLU on the VPU; store the
    # activation already cast to the compute dtype (h_ref dtype == x dtype).
    h_ref[...] = jnp.maximum(
        jnp.dot(x_ref[...], w1_ref[...], preferred_element_type=jnp.float32)
        + b1_ref[...].astype(jnp.float32),
        0.0,
    ).astype(h_ref.dtype)
    # dropout(p=0.1) is identity at inference time.
    y = (
        jnp.dot(h_ref[...], w2_ref[...], preferred_element_type=jnp.float32)
        + b2_ref[...].astype(jnp.float32)
    )
    o_ref[...] = y.astype(o_ref.dtype)


def mlp_stream_kernel(x_ref, w1_ref, b1_ref, w2_ref, b2_ref, o_ref, acc_ref):
    # D_hid-streamed path: grid = (batch, hid); hid axis last and "arbitrary".
    h = pl.program_id(1)

    @pl.when(h == 0)
    def _():
        acc_ref[...] = jnp.zeros_like(acc_ref)

    a = jnp.maximum(
        jnp.dot(x_ref[...], w1_ref[...], preferred_element_type=jnp.float32)
        + b1_ref[...].astype(jnp.float32),
        0.0,
    ).astype(w2_ref.dtype)
    acc_ref[...] += jnp.dot(a, w2_ref[...], preferred_element_type=jnp.float32)

    @pl.when(h == pl.num_programs(1) - 1)
    def _():
        o_ref[...] = (acc_ref[...] + b2_ref[...].astype(jnp.float32)).astype(o_ref.dtype)


# --------------------------------------------------------------------------------------
# Wrapper
# --------------------------------------------------------------------------------------

def mlp_forward(x, w1, b1, w2, b2, *, block_b=None, force_stream=False, max_t_hid=512):
    """x: [B, D_in]; w1: [D_in, D_hid]; b1: [1, D_hid]; w2: [D_hid, D_out]; b2: [1, D_out]."""
    B, D_in = x.shape
    D_hid = w1.shape[1]
    D_out = w2.shape[1]

    x_isz = jnp.dtype(x.dtype).itemsize
    w_isz = jnp.dtype(w1.dtype).itemsize
    h_isz = x_isz                                   # fc1 activation staged in compute dtype

    budget, num_tc = _tpu_budget_and_cores()
    headroom = 2 << 20
    row_align = max(8, 32 // max(x_isz, 1))         # sublane-aligned rows: 8 (f32) / 16 (bf16)

    # Lane-dense feature padding: unmasked output vst, full MXU columns.  Zero padding
    # is numerically exact through matmul + bias + ReLU.
    D_in_p = _round_up(D_in, 128)
    D_hid_p = _round_up(D_hid, 128)
    D_out_p = _round_up(D_out, 128)

    B_al = _round_up(max(B, 1), row_align)

    weight_factor = 1 if _BUFFERED_ONE is not None else 2
    weight_vmem = (D_in_p * D_hid_p + D_hid_p + D_hid_p * D_out_p + D_out_p) * w_isz
    per_row_resident = 2 * (D_in_p + D_out_p) * x_isz + D_hid_p * h_isz
    resident_avail = budget - headroom - weight_factor * weight_vmem
    use_resident = (not force_stream) and resident_avail >= row_align * per_row_resident

    # ---------------------------- resident-weight path --------------------------------
    if use_resident:
        cap = 512 if num_tc > 1 else 1024
        fit_rows = max(row_align,
                       (resident_avail // per_row_resident) // row_align * row_align)
        if block_b is None:
            bb = max(row_align, _round_up(pl.cdiv(B_al, 2), row_align)) if num_tc > 1 else B_al
            bb = min(cap, fit_rows, bb)
        else:
            bb = min(fit_rows, max(row_align, _round_up(block_b, row_align)))
        n_steps = pl.cdiv(B_al, bb)
        if num_tc > 1:
            n_steps = max(2, n_steps)
            if n_steps % 2:
                n_steps += 1
        bb = max(row_align, _round_up(pl.cdiv(B_al, n_steps), row_align))  # re-balance
        B_p = n_steps * bb

        x_p = _pad2(x, B_p, D_in_p)
        w1_p = _pad2(w1, D_in_p, D_hid_p)
        b1_p = _pad2(b1, 1, D_hid_p)
        w2_p = _pad2(w2, D_hid_p, D_out_p)
        b2_p = _pad2(b2, 1, D_out_p)

        flops = B_p * (2 * D_in_p * D_hid_p + 2 * D_hid_p * D_out_p)
        bytes_accessed = B_p * (D_in_p + D_out_p) * x_isz + weight_vmem

        def call(weight_mode):
            wf = 1 if weight_mode is not None else 2
            vmem_limit = int(min(budget, max(
                8 << 20, wf * weight_vmem + bb * per_row_resident + headroom)))
            grid_spec = pltpu.PrefetchScalarGridSpec(
                num_scalar_prefetch=0,
                grid=(n_steps,),
                in_specs=[
                    pl.BlockSpec((bb, D_in_p), lambda i: (i, 0)),          # x tile (pipelined)
                    _const_spec((D_in_p, D_hid_p), weight_mode),           # W1 (resident)
                    _const_spec((1, D_hid_p), weight_mode),                # b1
                    _const_spec((D_hid_p, D_out_p), weight_mode),          # W2 (resident)
                    _const_spec((1, D_out_p), weight_mode),                # b2
                ],
                out_specs=pl.BlockSpec((bb, D_out_p), lambda i: (i, 0)),   # lane-dense out
                scratch_shapes=[pltpu.VMEM((bb, D_hid_p), x.dtype)],       # fc1 act, compute dtype
            )
            return pl.pallas_call(
                mlp_resident_kernel,
                out_shape=jax.ShapeDtypeStruct((B_p, D_out_p), x.dtype),
                grid_spec=grid_spec,
                compiler_params=pltpu.CompilerParams(
                    dimension_semantics=("parallel",),
                    vmem_limit_bytes=vmem_limit,
                ),
                cost_estimate=pl.CostEstimate(
                    flops=flops, transcendentals=0, bytes_accessed=bytes_accessed),
            )(x_p, w1_p, b1_p, w2_p, b2_p)

        if _BUFFERED_ONE is not None:
            try:
                out_p = call(_BUFFERED_ONE)
            except (TypeError, NotImplementedError):
                # pipeline_mode accepted by BlockSpec but rejected by this lowering.
                out_p = call(None)
        else:
            out_p = call(None)
        return out_p[:B, :D_out]

    # -------------------- streamed (D_hid-tiled) fallback path -------------------------
    max_t_hid = max(128, (max_t_hid // 128) * 128)
    if block_b is None:
        bb = min(512, B_al)
        if num_tc > 1:
            bb = min(bb, max(row_align, _round_up(pl.cdiv(B_al, 2), row_align)))
    else:
        bb = max(row_align, _round_up(block_b, row_align))
    n_b = pl.cdiv(B_al, bb)
    if num_tc > 1:
        n_b = max(2, n_b)
        if n_b % 2:
            n_b += 1
    bb = max(row_align, _round_up(pl.cdiv(B_al, n_b), row_align))          # re-balance
    B_p = n_b * bb

    # Largest 128-multiple hid tile whose double-buffered W1/W2/b1 slices fit the budget.
    fixed = bb * (2 * D_in_p * x_isz + 2 * D_out_p * x_isz + 4 * D_out_p) + 2 * D_out_p * w_isz
    per_hid_col = 2 * (D_in_p + D_out_p + 1) * w_isz
    avail = budget - headroom - fixed
    t_hid = 128
    if avail > per_hid_col * 128:
        t_hid = min(max_t_hid, (avail // per_hid_col) // 128 * 128)
    t_hid = max(128, min(t_hid, D_hid_p))
    D_hid_s = _round_up(D_hid, t_hid)               # hid grid divides exactly (zero pad exact)
    n_hid = D_hid_s // t_hid

    x_p = _pad2(x, B_p, D_in_p)
    w1_p = _pad2(w1, D_in_p, D_hid_s)
    b1_p = _pad2(b1, 1, D_hid_s)
    w2_p = _pad2(w2, D_hid_s, D_out_p)
    b2_p = _pad2(b2, 1, D_out_p)

    flops = B_p * (2 * D_in_p * D_hid_s + 2 * D_hid_s * D_out_p)
    bytes_accessed = (B_p * (D_in_p + D_out_p) * x_isz
                      + n_b * (D_in_p * D_hid_s + D_hid_s + D_hid_s * D_out_p) * w_isz
                      + D_out_p * w_isz)
    vmem_limit = int(min(budget, max(8 << 20, fixed + per_hid_col * t_hid + headroom)))

    grid_spec = pltpu.PrefetchScalarGridSpec(
        num_scalar_prefetch=0,
        grid=(n_b, n_hid),
        in_specs=[
            pl.BlockSpec((bb, D_in_p), lambda i, h: (i, 0)),        # x tile (held across hid)
            pl.BlockSpec((D_in_p, t_hid), lambda i, h: (0, h)),     # W1 hid-slice (streamed)
            pl.BlockSpec((1, t_hid), lambda i, h: (0, h)),          # b1 hid-slice
            pl.BlockSpec((t_hid, D_out_p), lambda i, h: (h, 0)),    # W2 hid-slice (streamed)
            pl.BlockSpec((1, D_out_p), lambda i, h: (0, 0)),        # b2
        ],
        out_specs=pl.BlockSpec((bb, D_out_p), lambda i, h: (i, 0)),
        scratch_shapes=[pltpu.VMEM((bb, D_out_p), jnp.float32)],    # f32 accumulator
    )
    out_p = pl.pallas_call(
        mlp_stream_kernel,
        out_shape=jax.ShapeDtypeStruct((B_p, D_out_p), x.dtype),
        grid_spec=grid_spec,
        compiler_params=pltpu.CompilerParams(
            dimension_semantics=("parallel", "arbitrary"),
            vmem_limit_bytes=vmem_limit,
        ),
        cost_estimate=pl.CostEstimate(
            flops=flops, transcendentals=0, bytes_accessed=bytes_accessed),
    )(x_p, w1_p, b1_p, w2_p, b2_p)
    return out_p[:B, :D_out]


def init_mlp_params(key, input_dim, hidden_dim, output_dim, dtype=jnp.float32):
    # Deterministic init with PyTorch nn.Linear default uniform bounds (1/sqrt(fan_in)).
    k1, k2, k3, k4 = jax.random.split(key, 4)
    bound1 = 1.0 / (input_dim ** 0.5)
    bound2 = 1.0 / (hidden_dim ** 0.5)
    w1 = jax.random.uniform(k1, (input_dim, hidden_dim), dtype, -bound1, bound1)
    b1 = jax.random.uniform(k2, (1, hidden_dim), dtype, -bound1, bound1)
    w2 = jax.random.uniform(k3, (hidden_dim, output_dim), dtype, -bound2, bound2)
    b2 = jax.random.uniform(k4, (1, output_dim), dtype, -bound2, bound2)
    return w1, b1, w2, b2


if __name__ == "__main__":
    key = jax.random.PRNGKey(0)
    kx, kp, kp2 = jax.random.split(key, 3)

    def ref_mlp(x, w1, b1, w2, b2):
        return jnp.maximum(x @ w1 + b1, 0.0) @ w2 + b2   # dropout is identity in eval

    B, input_dim, hidden_dim, output_dim = 8, 32, 64, 16
    x = jax.random.normal(kx, (B, input_dim), jnp.float32)
    w1, b1, w2, b2 = init_mlp_params(kp, input_dim, hidden_dim, output_dim)

    # ---- resident-weight path, f32: tight-tolerance check ------------------------
    out = jax.block_until_ready(mlp_forward(x, w1, b1, w2, b2))
    ref = ref_mlp(x, w1, b1, w2, b2)
    assert out.shape == (B, output_dim)
    assert jnp.allclose(out, ref, atol=1e-5, rtol=1e-5)

    # ---- resident-weight path, bf16 weights/activations, f32 MXU accumulation ----
    xb = x.astype(jnp.bfloat16)
    w1b, b1b, w2b, b2b = (p.astype(jnp.bfloat16) for p in (w1, b1, w2, b2))
    out_bf = jax.block_until_ready(mlp_forward(xb, w1b, b1b, w2b, b2b))
    f32 = jnp.float32
    h_ref = jnp.maximum(xb.astype(f32) @ w1b.astype(f32) + b1b.astype(f32), 0.0)
    ref_bf = h_ref.astype(jnp.bfloat16).astype(f32) @ w2b.astype(f32) + b2b.astype(f32)
    assert out_bf.shape == (B, output_dim)
    assert jnp.allclose(out_bf.astype(f32), ref_bf, atol=5e-2, rtol=5e-2)

    # ---- streamed (D_hid-tiled) path, forced, 3 hid steps -------------------------
    B2, hid2 = 16, 384
    x2 = jax.random.normal(kx, (B2, input_dim), jnp.float32)
    w1s, b1s, w2s, b2s = init_mlp_params(kp2, input_dim, hid2, output_dim)
    out_s = jax.block_until_ready(
        mlp_forward(x2, w1s, b1s, w2s, b2s, force_stream=True, max_t_hid=128))
    ref_s = ref_mlp(x2, w1s, b1s, w2s, b2s)
    assert out_s.shape == (B2, output_dim)
    assert jnp.allclose(out_s, ref_s, atol=5e-4, rtol=5e-4)

    print("KERNEL_OK")
</pallas_src>

<mosaic_0001>
module attributes {stable_mosaic.version = 11 : i64} {
  func.func @mlp_resident_kernel(%arg0: i32, %arg1: memref<8x128xf32, #tpu.memory_space<vmem>>, %arg2: memref<128x128xf32, #tpu.memory_space<vmem>>, %arg3: memref<1x128xf32, #tpu.memory_space<vmem>>, %arg4: memref<128x128xf32, #tpu.memory_space<vmem>>, %arg5: memref<1x128xf32, #tpu.memory_space<vmem>>, %arg6: memref<8x128xf32, #tpu.memory_space<vmem>>, %arg7: memref<8x128xf32, #tpu.memory_space<vmem>>) attributes {dimension_semantics = [#tpu.dimension_semantics<parallel>], iteration_bounds = array<i64: 1>, scalar_prefetch = 0 : i64, scratch_operands = 1 : i64, tpu.core_type = #tpu.core_type<tc>, window_params = [{transform_indices = @transform_0, window_bounds = array<i64: 8, 128>}, {pipeline_mode = #tpu.pipeline_mode<synchronous>, transform_indices = @transform_1, window_bounds = array<i64: 128, 128>}, {pipeline_mode = #tpu.pipeline_mode<synchronous>, transform_indices = @transform_2, window_bounds = array<i64: 1, 128>}, {pipeline_mode = #tpu.pipeline_mode<synchronous>, transform_indices = @transform_3, window_bounds = array<i64: 128, 128>}, {pipeline_mode = #tpu.pipeline_mode<synchronous>, transform_indices = @transform_4, window_bounds = array<i64: 1, 128>}, {transform_indices = @transform_5, window_bounds = array<i64: 8, 128>}]} {
    %c0 = arith.constant 0 : index
    %c0_0 = arith.constant 0 : index
    %0 = vector.load %arg1[%c0, %c0_0] : memref<8x128xf32, #tpu.memory_space<vmem>>, vector<8x128xf32>
    %c0_1 = arith.constant 0 : index
    %c0_2 = arith.constant 0 : index
    %1 = vector.load %arg2[%c0_1, %c0_2] : memref<128x128xf32, #tpu.memory_space<vmem>>, vector<128x128xf32>
    %cst = arith.constant dense<0.000000e+00> : vector<8x128xf32>
    %2 = tpu.matmul %0, %1, %cst {dimension_numbers = #tpu.dot_dimension_numbers<[1], [0], [0], [1], [0, 0, 1, 1], [], []>} : vector<8x128xf32>, vector<128x128xf32>, vector<8x128xf32> -> vector<8x128xf32>
    %c0_3 = arith.constant 0 : index
    %c0_4 = arith.constant 0 : index
    %3 = vector.load %arg3[%c0_3, %c0_4] : memref<1x128xf32, #tpu.memory_space<vmem>>, vector<1x128xf32>
    %4 = vector.broadcast %3 : vector<1x128xf32> to vector<8x128xf32>
    %5 = arith.addf %2, %4 : vector<8x128xf32>
    %cst_5 = arith.constant 0.000000e+00 : f32
    %6 = vector.broadcast %cst_5 : f32 to vector<8x128xf32>
    %7 = arith.maximumf %5, %6 : vector<8x128xf32>
    %c0_6 = arith.constant 0 : index
    %c0_7 = arith.constant 0 : index
    %8 = vector.load %arg7[%c0_6, %c0_7] : memref<8x128xf32, #tpu.memory_space<vmem>>, vector<8x128xf32>
    tpu.vector_store %arg7[%c0_6, %c0_7], %7 {strides = array<i32>} : memref<8x128xf32, #tpu.memory_space<vmem>>, vector<8x128xf32>,
    %c0_8 = arith.constant 0 : index
    %c0_9 = arith.constant 0 : index
    %9 = vector.load %arg7[%c0_8, %c0_9] : memref<8x128xf32, #tpu.memory_space<vmem>>, vector<8x128xf32>
    %c0_10 = arith.constant 0 : index
    %c0_11 = arith.constant 0 : index
    %10 = vector.load %arg4[%c0_10, %c0_11] : memref<128x128xf32, #tpu.memory_space<vmem>>, vector<128x128xf32>
    %cst_12 = arith.constant dense<0.000000e+00> : vector<8x128xf32>
    %11 = tpu.matmul %9, %10, %cst_12 {dimension_numbers = #tpu.dot_dimension_numbers<[1], [0], [0], [1], [0, 0, 1, 1], [], []>} : vector<8x128xf32>, vector<128x128xf32>, vector<8x128xf32> -> vector<8x128xf32>
    %c0_13 = arith.constant 0 : index
    %c0_14 = arith.constant 0 : index
    %12 = vector.load %arg5[%c0_13, %c0_14] : memref<1x128xf32, #tpu.memory_space<vmem>>, vector<1x128xf32>
    %13 = vector.broadcast %12 : vector<1x128xf32> to vector<8x128xf32>
    %14 = arith.addf %11, %13 : vector<8x128xf32>
    %c0_15 = arith.constant 0 : index
    %c0_16 = arith.constant 0 : index
    %15 = vector.load %arg6[%c0_15, %c0_16] : memref<8x128xf32, #tpu.memory_space<vmem>>, vector<8x128xf32>
    tpu.vector_store %arg6[%c0_15, %c0_16], %14 {strides = array<i32>} : memref<8x128xf32, #tpu.memory_space<vmem>>, vector<8x128xf32>,
    return
  }
  func.func @transform_0(%arg0: i32) -> (i32, i32) {
    %c0_i32 = arith.constant 0 : i32
    %c0_i32_0 = arith.constant 0 : i32
    return %arg0, %c0_i32 : i32, i32
  }
  func.func @transform_1(%arg0: i32) -> (i32, i32) {
    %c0_i32 = arith.constant 0 : i32
    %c0_i32_0 = arith.constant 0 : i32
    %c0_i32_1 = arith.constant 0 : i32
    return %c0_i32, %c0_i32_0 : i32, i32
  }
  func.func @transform_2(%arg0: i32) -> (i32, i32) {
    %c0_i32 = arith.constant 0 : i32
    %c0_i32_0 = arith.constant 0 : i32
    %c0_i32_1 = arith.constant 0 : i32
    return %c0_i32, %c0_i32_0 : i32, i32
  }
  func.func @transform_3(%arg0: i32) -> (i32, i32) {
    %c0_i32 = arith.constant 0 : i32
    %c0_i32_0 = arith.constant 0 : i32
    %c0_i32_1 = arith.constant 0 : i32
    return %c0_i32, %c0_i32_0 : i32, i32
  }
  func.func @transform_4(%arg0: i32) -> (i32, i32) {
    %c0_i32 = arith.constant 0 : i32
    %c0_i32_0 = arith.constant 0 : i32
    %c0_i32_1 = arith.constant 0 : i32
    return %c0_i32, %c0_i32_0 : i32, i32
  }
  func.func @transform_5(%arg0: i32) -> (i32, i32) {
    %c0_i32 = arith.constant 0 : i32
    %c0_i32_0 = arith.constant 0 : i32
    return %arg0, %c0_i32 : i32, i32
  }
}

</mosaic_0001>

<bundles_post_ra>
// kernel: tpu_custom_call.1
= control target key start
LH: loop header
LB: loop body
LE: loop exit
PB: predicated region body
PF: predicated region fallthrough
CT: control target
= control target key end

     0   :  { %10 = vsyncpa [#allocation4], 0  ;;  %s639_s0 = inlined_call_operand.hbm [shape: f32[8,128], index: 0, kind: input, shape index: {}]   ;;  %s640_s1 = inlined_call_operand.hbm [shape: f32[128,128], index: 1, kind: input, shape index: {}]   ;;  %s641_s2 = inlined_call_operand.vmem [shape: f32[1,128], index: 2, kind: input, shape index: {}]   ;;  %s642_s3 = inlined_call_operand.hbm [shape: f32[128,128], index: 3, kind: input, shape index: {}]   ;;  %s643_s4 = inlined_call_operand.vmem [shape: f32[1,128], index: 4, kind: input, shape index: {}]   ;;  %s644_s5 = inlined_call_operand.hbm [shape: f32[8,128], index: 5, kind: output, shape index: {}]  }
   0x1   :  { %11 = vsyncpa [#allocation7], 0 }
   0x2   :  { %12 = vsyncpa [#allocation5], 0  ;;  %s524_s18 = smov [#allocation6]   ;;  %s430_s22 = scalar_lea.hbm %s640_s1, 2048 }
   0x3   :  { %s28_s19 = sshll.u32 %s524_s18, 4  ;;  %p431_p0 = scmp.ne.s32.totalorder %s640_s1, %s430_s22  ;;  %s29_s19 = int_to_ptr.vmem [resolvable:$true] %s28_s19 }
   0x4   :  { %p434_p1 = scmp.lt.u32.totalorder %s430_s22, %s640_s1 }
   0x6   :  { %p436_p2 = pnand %p434_p1, %p431_p0 }
   0x8   :  { %439 = shalt.err (!%p436_p2)
}
   0x9   :  { %s440_s27 = scalar_lea.vmem %s29_s19, 2048  ;;  %p445_p4 = scmp.lt.s32.totalorder %s29_s19, %s29_s19 }
   0xa   :  { %p441_p3 = scmp.ne.s32.totalorder %s29_s19, %s440_s27  ;;  %p446_p5 = scmp.lt.s32.totalorder %s440_s27, %s440_s27 }
   0xc   :  { %p447_p6 = por %p446_p5, %p445_p4 }
   0xe   :  { %p448_p7 = pnand %p447_p6, %p441_p3 }
  0x10   :  { %451 = shalt.err (!%p448_p7)
}
  0x11   :  { %s525_s28 = smov 128   ;;  %s526_s29 = smov 8  }
  0x12   :  { %34 = dma.hbm_to_vmem [thread:$0]  %s640_s1, 2048, %s29_s19, [#allocation7], %s525_s28, %s525_s28, %s526_s29  }
  0x13   :  { %s527_s7 = smov [#allocation3]   ;;  %s528_s9 = smov [#allocation8]  }
  0x14   :  { %s19_s8 = sshll.u32 %s527_s7, 4  ;;  %s42_s10 = sshll.u32 %s528_s9, 4  ;;  %s20_s8 = int_to_ptr.vmem [resolvable:$true] %s19_s8  ;;  %s43_s10 = int_to_ptr.vmem [resolvable:$true] %s42_s10 }
  0x15   :  { %s452_s13 = scalar_lea.hbm %s639_s0, 128 }
  0x16   :  { %p453_p8 = scmp.ne.s32.totalorder %s639_s0, %s452_s13  ;;  %p456_p9 = scmp.lt.u32.totalorder %s452_s13, %s639_s0 }
  0x18   :  { %p458_p10 = pnand %p456_p9, %p453_p8 }
  0x1a   :  { %461 = shalt.err (!%p458_p10)
}
  0x1b   :  { %s462_s1 = scalar_lea.vmem %s20_s8, 128  ;;  %p467_p12 = scmp.lt.s32.totalorder %s20_s8, %s20_s8 }
  0x1c   :  { %p463_p11 = scmp.ne.s32.totalorder %s20_s8, %s462_s1  ;;  %p468_p13 = scmp.lt.s32.totalorder %s462_s1, %s462_s1 }
  0x1e   :  { %p469_p0 = por %p468_p13, %p467_p12 }
  0x20   :  { %p470_p1 = pnand %p469_p0, %p463_p11 }
  0x22   :  { %473 = shalt.err (!%p470_p1)
}
  0x23   :  { %22 = dma.hbm_to_vmem [thread:$0]  %s639_s0, 128, %s20_s8, [#allocation4]  }
  0x24   :  { %s474_s22 = scalar_lea.hbm %s642_s3, 2048 }
  0x25   :  { %p475_p2 = scmp.ne.s32.totalorder %s642_s3, %s474_s22  ;;  %p478_p3 = scmp.lt.u32.totalorder %s474_s22, %s642_s3 }
  0x27   :  { %p480_p4 = pnand %p478_p3, %p475_p2 }
  0x29   :  { %483 = shalt.err (!%p480_p4)
}
  0x2a   :  { %s484_s27 = scalar_lea.vmem %s43_s10, 2048  ;;  %p489_p6 = scmp.lt.s32.totalorder %s43_s10, %s43_s10 }
  0x2b   :  { %p485_p5 = scmp.ne.s32.totalorder %s43_s10, %s484_s27  ;;  %p490_p7 = scmp.lt.s32.totalorder %s484_s27, %s484_s27 }
  0x2d   :  { %p491_p8 = por %p490_p7, %p489_p6 }
  0x2f   :  { %p492_p9 = pnand %p491_p8, %p485_p5 }
  0x31   :  { %495 = shalt.err (!%p492_p9)
}
  0x32   :  { %48 = dma.hbm_to_vmem [thread:$0]  %s642_s3, 2048, %s43_s10, [#allocation7], %s525_s28, %s525_s28, %s526_s29  }
  0x33   :  { %518 = dma.done.wait [#allocation4], 128  }
  0x34   :  { %519 = vsyncadd [#allocation4], 4294967168 }
  0x35   :  { %520 = dma.done.wait [#allocation7], 4096  }
  0x36   :  { %521 = vsyncadd [#allocation7], 4294963200  ;;  %v529_v0 = vmov 0.0|0.0   ;;  %vm530_vm0 = vmmov 0   ;;  %v531_v1 = vmov 0.0   ;;  %v61_v2 = vld [vmem:[#allocation6] sm:$0xff] }
  0x37   :  { %373 = vmatprep.subr.bf16.mxu0 %v529_v0  ;;  %335 = vmatprep.mubr.msk.f32.mxu0 %vm530_vm0, %v531_v1  ;;  %v62_v3 = vld [vmem:[#allocation6 + $0x8] sm:$0xff]  ;;  %v63_v4 = vld [vmem:[#allocation6 + $0x10] sm:$0xff]  ;;  %v64_v6 = vld [vmem:[#allocation6 + $0x18] sm:$0xff]  ;;  %s532_s7 = smov [#allocation9]  }
  0x38   :  { %397 = vmatprep.subr.bf16.mxu1 %v529_v0  ;;  %370 = vmatprep.mubr.msk.f32.mxu1 %vm530_vm0, %v531_v1  ;;  %v374_v5 = vpack.c.bf16 %v62_v3, %v61_v2  ;;  %v377_v7 = vpack.c.bf16 %v64_v6, %v63_v4  ;;  %v65_v8 = vld [vmem:[#allocation6 + $0x20] sm:$0xff]  ;;  %v66_v9 = vld [vmem:[#allocation6 + $0x28] sm:$0xff]  ;;  %v159_v12 = vld [vmem:[#allocation8 + $0x10] sm:$0xff]  ;;  %s257_s8 = sshll.u32 %s532_s7, 4  ;;  %s258_s8 = int_to_ptr.vmem [resolvable:$true] %s257_s8 }
  0x39   :  { %v157_v10 = vld [vmem:[#allocation8] sm:$0xff]  ;;  %v158_v11 = vld [vmem:[#allocation8 + $0x8] sm:$0xff]  ;;  %v160_v13 = vld [vmem:[#allocation8 + $0x18] sm:$0xff]  ;;  %v380_v14 = vpack.c.bf16 %v66_v9, %v65_v8  ;;  %s496_s9 = scalar_lea.vmem %s258_s8, 128  ;;  %p501_p11 = scmp.lt.s32.totalorder %s258_s8, %s258_s8 }
  0x3a   :  { %375 = vmatpush3.bf16.msra.mxu0 %v374_v5  ;;  %v398_v15 = vpack.c.bf16 %v158_v11, %v157_v10  ;;  %v67_v16 = vld [vmem:[#allocation6 + $0x30] sm:$0xff]  ;;  %v68_v17 = vld [vmem:[#allocation6 + $0x38] sm:$0xff]  ;;  %v401_v18 = vpack.c.bf16 %v160_v13, %v159_v12  ;;  %v161_v19 = vld [vmem:[#allocation8 + $0x20] sm:$0xff]  ;;  %p497_p10 = scmp.ne.s32.totalorder %s258_s8, %s496_s9  ;;  %p502_p12 = scmp.lt.s32.totalorder %s496_s9, %s496_s9 }
  0x3b   :  { %376 = vmatprep.subr.bf16.mxu0 %v529_v0  ;;  %v162_v20 = vld [vmem:[#allocation8 + $0x28] sm:$0xff]  ;;  %v383_v21 = vpack.c.bf16 %v68_v17, %v67_v16  ;;  %v69_v22 = vld [vmem:[#allocation6 + $0x40] sm:$0xff]  ;;  %v163_v25 = vld [vmem:[#allocation8 + $0x30] sm:$0xff] }
  0x3c   :  { %399 = vmatpush3.bf16.msra.mxu1 %v398_v15  ;;  %v70_v23 = vld [vmem:[#allocation6 + $0x48] sm:$0xff]  ;;  %v404_v24 = vpack.c.bf16 %v162_v20, %v161_v19  ;;  %v164_v26 = vld [vmem:[#allocation8 + $0x38] sm:$0xff]  ;;  %v71_v28 = vld [vmem:[#allocation6 + $0x50] sm:$0xff]  ;;  %p503_p13 = por %p502_p12, %p501_p11 }
  0x3d   :  { %400 = vmatprep.subr.bf16.mxu1 %v529_v0  ;;  %v386_v27 = vpack.c.bf16 %v70_v23, %v69_v22  ;;  %v72_v29 = vld [vmem:[#allocation6 + $0x58] sm:$0xff]  ;;  %v407_v30 = vpack.c.bf16 %v164_v26, %v163_v25  ;;  %v165_v31 = vld [vmem:[#allocation8 + $0x40] sm:$0xff]  ;;  %v166_v32 = vld [vmem:[#allocation8 + $0x48] sm:$0xff] }
  0x3e   :  { %378 = vmatpush3.bf16.msra.mxu0 %v377_v7  ;;  %v389_v33 = vpack.c.bf16 %v72_v29, %v71_v28  ;;  %v73_v34 = vld [vmem:[#allocation6 + $0x60] sm:$0xff]  ;;  %v74_v35 = vld [vmem:[#allocation6 + $0x68] sm:$0xff]  ;;  %v410_v36 = vpack.c.bf16 %v166_v32, %v165_v31  ;;  %v167_v37 = vld [vmem:[#allocation8 + $0x50] sm:$0xff]  ;;  %p504_p0 = pnand %p503_p13, %p497_p10 }
  0x3f   :  { %379 = vmatprep.subr.bf16.mxu0 %v529_v0  ;;  %v168_v38 = vld [vmem:[#allocation8 + $0x58] sm:$0xff]  ;;  %v392_v39 = vpack.c.bf16 %v74_v35, %v73_v34  ;;  %v75_v40 = vld [vmem:[#allocation6 + $0x70] sm:$0xff]  ;;  %v169_v43 = vld [vmem:[#allocation8 + $0x60] sm:$0xff] }
  0x40   :  { %402 = vmatpush3.bf16.msra.mxu1 %v401_v18  ;;  %v76_v41 = vld [vmem:[#allocation6 + $0x78] sm:$0xff]  ;;  %v413_v42 = vpack.c.bf16 %v168_v38, %v167_v37  ;;  %v170_v44 = vld [vmem:[#allocation8 + $0x68] sm:$0xff]  ;;  %v171_v48 = vld [vmem:[#allocation8 + $0x70] sm:$0xff] }
  0x41   :  { %403 = vmatprep.subr.bf16.mxu1 %v529_v0  ;;  %v395_v45 = vpack.c.bf16 %v76_v41, %v75_v40  ;;  %v416_v46 = vpack.c.bf16 %v170_v44, %v169_v43  ;;  %v60_v47 = vld [vmem:[#allocation3] sm:$0xff] }
  0x42   :  { %381 = vmatpush3.bf16.msra.mxu0 %v380_v14  ;;  %v172_v49 = vld [vmem:[#allocation8 + $0x78] sm:$0xff] }
  0x43   :  { %382 = vmatprep.subr.bf16.mxu0 %v529_v0  ;;  %v419_v50 = vpack.c.bf16 %v172_v49, %v171_v48  ;;  %v267_v51 = vld [vmem:[%s641_s2] ss:$0 sm:$0xff] }
  0x44   :  { %405 = vmatpush3.bf16.msra.mxu1 %v404_v24  ;;  %v268_v56 = vld [vmem:[%s643_s4] ss:$0 sm:$0xff] }
  0x45   :  { %406 = vmatprep.subr.bf16.mxu1 %v529_v0 }
  0x46   :  { %384 = vmatpush3.bf16.msra.mxu0 %v383_v21 }
  0x47   :  { %385 = vmatprep.subr.bf16.mxu0 %v529_v0 }
  0x48   :  { %408 = vmatpush3.bf16.msra.mxu1 %v407_v30 }
  0x49   :  { %409 = vmatprep.subr.bf16.mxu1 %v529_v0 }
  0x4a   :  { %387 = vmatpush3.bf16.msra.mxu0 %v386_v27 }
  0x4b   :  { %388 = vmatprep.subr.bf16.mxu0 %v529_v0 }
  0x4c   :  { %411 = vmatpush3.bf16.msra.mxu1 %v410_v36 }
  0x4d   :  { %412 = vmatprep.subr.bf16.mxu1 %v529_v0 }
  0x4e   :  { %390 = vmatpush3.bf16.msra.mxu0 %v389_v33 }
  0x4f   :  { %391 = vmatprep.subr.bf16.mxu0 %v529_v0 }
  0x50   :  { %414 = vmatpush3.bf16.msra.mxu1 %v413_v42 }
  0x51   :  { %415 = vmatprep.subr.bf16.mxu1 %v529_v0 }
  0x52   :  { %393 = vmatpush3.bf16.msra.mxu0 %v392_v39 }
  0x53   :  { %394 = vmatprep.subr.bf16.mxu0 %v529_v0 }
  0x54   :  { %417 = vmatpush3.bf16.msra.mxu1 %v416_v46 }
  0x55   :  { %418 = vmatprep.subr.bf16.mxu1 %v529_v0 }
  0x56   :  { %396 = vmatpush3.bf16.msra.mxu0 %v395_v45 }
  0x58   :  { %420 = vmatpush3.bf16.msra.mxu1 %v419_v50 }
  0x59   :  { %336 = vmatmul.mubr.f32.vlgmr.msra.gmra.mrb[0].mxu0 %v60_v47 }
 0x12c   :  { %v150_v52 = vpop.f32.mrb[0].mxu0 }
 0x12d   :  { %v151_v53 = vadd.f32 %v267_v51, %v150_v52  ;;  %v337_v54 = vpop.f32.mrb[1].mxu0 }
 0x12f   :  { %v154_v55 = vmax.f32 %v151_v53, 0.0 }
 0x131   :  { %371 = vmatmul.mubr.f32.vlgmr.msra.gmra.mrb[0].mxu1 %v154_v55 }
 0x204   :  { %v246_v57 = vpop.f32.mrb[0].mxu1 }
 0x205   :  { %v247_v58 = vadd.f32 %v268_v56, %v246_v57  ;;  %v372_v59 = vpop.f32.mrb[1].mxu1 }
 0x207   :  { %250 = vst [vmem:[#allocation9] sm:$0xff] %v247_v58 }
 0x208   :  { %507 = shalt.err (!%p504_p0)
}
 0x209   :  { %s508_s11 = scalar_lea.hbm %s644_s5, 128 }
 0x20a   :  { %p509_p1 = scmp.ne.s32.totalorder %s644_s5, %s508_s11  ;;  %p512_p2 = scmp.lt.u32.totalorder %s508_s11, %s644_s5 }
 0x20c   :  { %p514_p3 = pnand %p512_p2, %p509_p1 }
 0x20e   :  { %517 = shalt.err (!%p514_p3)
}
 0x20f   :  { %260 = dma.vmem_to_hbm [thread:$0]  %s258_s8, 128, %s644_s5, [#allocation5]  }
 0x210   :  { %522 = dma.done.wait [#allocation5], 128  }
 0x211   :  { %523 = vsyncadd [#allocation5], 4294967168 }
 0x212   :  { %264 = vsyncpa [#allocation4], 1 }
 0x213   :  { %265 = vsyncpa [#allocation7], 1 }
 0x214   :  { %266 = vsyncpa [#allocation5], 1 }

</bundles_post_ra>
